<compile_context>
chip_gen: v7x
topology: tpu7x:2x2x1
jax: 0.10.0
libtpu: 0.0.40
codegen_flags: <defaults>
</compile_context>

<pallas_src>
import functools

import jax
import jax.numpy as jnp
from jax.experimental import pallas as pl
from jax.experimental.pallas import tpu as pltpu

_LANE = 128
_SUBLANE = 8
_ALIGN = _LANE * _SUBLANE          # 1024-element alignment for the (M, 128) slab
_ACC_ROWS = 256                    # fixed accumulator height (256*128*4 = 128 KiB)


def _default_num_splits():
    """2-way TensorCore split only where it can actually run concurrently (v7x)."""
    try:
        dev = jax.devices()[0]
        if dev.platform != "tpu":
            return 1
        kind = getattr(dev, "device_kind", "").lower()
        if "v7" in kind:           # v7x: 2 TensorCores per chip
            return 2
    except Exception:
        pass
    return 1                       # v5e / v6e: single TensorCore


def _mse_partial_kernel(s_ref, t_ref, out_ref, acc_ref, *, tile_rows, acc_rows,
                        blocks_per_split, total_rows):
    j = pl.program_id(0)           # core/split axis ("parallel")
    k = pl.program_id(1)           # streaming reduction axis ("arbitrary")

    @pl.when(k == 0)
    def _():
        acc_ref[...] = jnp.zeros_like(acc_ref)

    # Global starting row of this (unclamped) block; used both to gate the
    # tail mask and to build the row-validity mask itself.
    block_start = (j * blocks_per_split + k) * tile_rows

    # f32 diff for all dtypes (bf16 inputs still stream in bf16 — half the
    # DMA traffic — and are upcast here; a bf16-subtract variant would save
    # one cast/vreg on v6e/v7x but changes numerics slightly, so not enabled).
    d = s_ref[...].astype(jnp.float32) - t_ref[...].astype(jnp.float32)

    def fold_into_acc(v):
        # Square and fold the (tile_rows, 128) block down onto the fixed
        # (acc_rows, 128) accumulator: pure VALU adds across vregs (no XLU),
        # ~1 add per input vreg, but only acc_rows rows of VMEM acc traffic.
        sq = v * v
        part = sq[0:acc_rows, :]
        for r in range(acc_rows, tile_rows, acc_rows):
            part = part + sq[r:r + acc_rows, :]
        acc_ref[...] += part

    is_full = block_start + tile_rows <= total_rows

    @pl.when(is_full)
    def _():
        # Steady-state path: no iota / compare / select.
        fold_into_acc(d)

    @pl.when(jnp.logical_not(is_full))
    def _():
        # Only the last (partial) block of the slab and clamped dummy blocks
        # take this path; rows past the end of the slab are zeroed.
        row_ids = jax.lax.broadcasted_iota(jnp.int32, (tile_rows, _LANE), 0)
        valid = (row_ids + block_start) < total_rows
        fold_into_acc(jnp.where(valid, d, jnp.float32(0.0)))

    @pl.when(k == pl.num_programs(1) - 1)
    def _():
        # Single cross-lane/sublane reduce per split, into this split's own
        # SMEM output element (no cross-core sharing under "parallel").
        out_ref[0, 0] = jnp.sum(acc_ref[...])


def feature_distillation_loss(student_features, teacher_features, *,
                              tile_rows=None, n_split=None):
    """F.mse_loss(student, teacher) with reduction='mean' (PyTorch default)."""
    assert student_features.shape == teacher_features.shape
    assert student_features.dtype == teacher_features.dtype
    n = student_features.size
    dtype = student_features.dtype
    itemsize = int(jnp.dtype(dtype).itemsize)

    s_flat = student_features.reshape(-1)
    t_flat = teacher_features.reshape(-1)

    # Ragged tail (< 1024 elements): tiny plain-JAX sum of squared diffs.
    # This replaces the previous jnp.pad, which was a full HBM read+write of
    # both inputs whenever n % 1024 != 0.
    aligned = (n // _ALIGN) * _ALIGN
    tail = n - aligned
    if tail:
        dt = (s_flat[aligned:].astype(jnp.float32)
              - t_flat[aligned:].astype(jnp.float32))
        tail_sum = jnp.sum(dt * dt)
    else:
        tail_sum = jnp.float32(0.0)

    if aligned == 0:
        # Input smaller than one aligned chunk: nothing for the kernel to do.
        return tail_sum * jnp.float32(1.0 / float(n))

    M = aligned // _LANE                          # multiple of 8 (sublane)
    s2 = s_flat[:aligned].reshape(M, _LANE)       # free bitcast when n is aligned
    t2 = t_flat[:aligned].reshape(M, _LANE)

    # Tile sizing: target ~4 MiB per input block (8192 rows f32, 16384 bf16);
    # always <= M, always a multiple of the accumulator height.
    if tile_rows is None:
        tile_rows = (4 << 20) // (_LANE * itemsize)
    if M >= _ACC_ROWS:
        acc_rows = _ACC_ROWS
        tile_rows = max(acc_rows, (min(tile_rows, M) // acc_rows) * acc_rows)
    else:
        tile_rows = M
        acc_rows = M

    nb = pl.cdiv(M, tile_rows)                    # total number of row blocks
    if n_split is None:
        n_split = _default_num_splits()
    n_split = max(1, min(n_split, nb))            # never more splits than blocks
    bps = pl.cdiv(nb, n_split)                    # blocks handled per split

    def in_map(j, k):
        # Clamp so dummy (j, k) pairs past the end point at a valid block;
        # their contribution is fully masked inside the kernel.
        return (jnp.minimum(j * bps + k, nb - 1), 0)

    kernel = functools.partial(
        _mse_partial_kernel, tile_rows=tile_rows, acc_rows=acc_rows,
        blocks_per_split=bps, total_rows=M)

    # Explicit VMEM budget: 2 inputs x 2 pipeline buffers + the small
    # accumulator, plus headroom (f32 default ~26 MiB: fine on v5e/v6e 128 MiB
    # physical and under v7x's 64 MiB per-TC VMEM).
    block_bytes = tile_rows * _LANE * itemsize
    vmem_need = 2 * 2 * block_bytes + acc_rows * _LANE * 4
    vmem_limit = max(16 << 20, min(vmem_need * 3 // 2 + (2 << 20), 64 << 20))

    cost = pl.CostEstimate(
        flops=3 * n,                               # sub, mul, add per element
        transcendentals=0,
        bytes_accessed=2 * aligned * itemsize + 4 * n_split)

    partials = pl.pallas_call(
        kernel,
        out_shape=jax.ShapeDtypeStruct((n_split, 1), jnp.float32),
        grid_spec=pltpu.PrefetchScalarGridSpec(
            num_scalar_prefetch=0,
            grid=(n_split, bps),
            in_specs=[
                pl.BlockSpec((tile_rows, _LANE), in_map),
                pl.BlockSpec((tile_rows, _LANE), in_map),
            ],
            out_specs=pl.BlockSpec(
                (1, 1), lambda j, k: (j, 0), memory_space=pltpu.SMEM),
            scratch_shapes=[pltpu.VMEM((acc_rows, _LANE), jnp.float32)],
        ),
        compiler_params=pltpu.CompilerParams(
            dimension_semantics=("parallel", "arbitrary"),
            vmem_limit_bytes=int(vmem_limit)),
        cost_estimate=cost,
    )(s2, t2)

    return (jnp.sum(partials) + tail_sum) * jnp.float32(1.0 / float(n))


if __name__ == "__main__":
    key = jax.random.PRNGKey(0)
    k1, k2, k3, k4 = jax.random.split(key, 4)

    # Primary test: small NCHW feature maps (batch=2, channels=4, 16x16).
    student = jax.random.normal(k1, (2, 4, 16, 16), dtype=jnp.float32)
    teacher = jax.random.normal(k2, (2, 4, 16, 16), dtype=jnp.float32)
    loss = feature_distillation_loss(student, teacher)
    jax.block_until_ready(loss)
    ref = jnp.mean((student - teacher) ** 2)
    assert jnp.allclose(loss, ref, rtol=1e-5, atol=1e-6), (loss, ref)

    # Secondary test: size not a multiple of 1024 and not a multiple of the
    # tile -> exercises the plain-JAX tail and the masked partial block.
    s2 = jax.random.normal(k3, (2, 4, 40, 120), dtype=jnp.float32)
    t2 = jax.random.normal(k4, (2, 4, 40, 120), dtype=jnp.float32)
    loss2 = feature_distillation_loss(s2, t2)
    jax.block_until_ready(loss2)
    ref2 = jnp.mean((s2 - t2) ** 2)
    assert jnp.allclose(loss2, ref2, rtol=1e-5, atol=1e-6), (loss2, ref2)

    print("KERNEL_OK")
</pallas_src>

<mosaic_0001>
module attributes {stable_mosaic.version = 11 : i64} {
  func.func @_mse_partial_kernel(%arg0: i32, %arg1: i32, %arg2: memref<16x128xf32, #tpu.memory_space<vmem>>, %arg3: memref<16x128xf32, #tpu.memory_space<vmem>>, %arg4: memref<1x1xf32, #tpu.memory_space<smem>>, %arg5: memref<16x128xf32, #tpu.memory_space<vmem>>) attributes {dimension_semantics = [#tpu.dimension_semantics<parallel>, #tpu.dimension_semantics<arbitrary>], iteration_bounds = array<i64: 1, 1>, scalar_prefetch = 0 : i64, scratch_operands = 1 : i64, tpu.core_type = #tpu.core_type<tc>, window_params = [{transform_indices = @transform_0, window_bounds = array<i64: 16, 128>}, {transform_indices = @transform_1, window_bounds = array<i64: 16, 128>}, {transform_indices = @transform_2, window_bounds = array<i64: 1, 1>}]} {
    %c0_i32 = arith.constant 0 : i32
    %0 = arith.cmpi eq, %arg1, %c0_i32 : i32
    %1 = arith.extui %0 : i1 to i32
    %c0_i32_0 = arith.constant 0 : i32
    %2 = arith.cmpi ne, %1, %c0_i32_0 : i32
    scf.if %2 {
      %cst = arith.constant 0.000000e+00 : f32
      %19 = vector.broadcast %cst : f32 to vector<16x128xf32>
      %c0_10 = arith.constant 0 : index
      %c0_11 = arith.constant 0 : index
      %20 = vector.load %arg5[%c0_10, %c0_11] : memref<16x128xf32, #tpu.memory_space<vmem>>, vector<16x128xf32>
      tpu.vector_store %arg5[%c0_10, %c0_11], %19 {strides = array<i32>} : memref<16x128xf32, #tpu.memory_space<vmem>>, vector<16x128xf32>,
    } else {
    }
    %c1_i32 = arith.constant 1 : i32
    %3 = arith.muli %arg0, %c1_i32 : i32
    %4 = arith.addi %3, %arg1 : i32
    %c16_i32 = arith.constant 16 : i32
    %5 = arith.muli %4, %c16_i32 : i32
    %c0 = arith.constant 0 : index
    %c0_1 = arith.constant 0 : index
    %6 = vector.load %arg2[%c0, %c0_1] : memref<16x128xf32, #tpu.memory_space<vmem>>, vector<16x128xf32>
    %c0_2 = arith.constant 0 : index
    %c0_3 = arith.constant 0 : index
    %7 = vector.load %arg3[%c0_2, %c0_3] : memref<16x128xf32, #tpu.memory_space<vmem>>, vector<16x128xf32>
    %8 = arith.subf %6, %7 : vector<16x128xf32>
    %c16_i32_4 = arith.constant 16 : i32
    %9 = arith.addi %5, %c16_i32_4 : i32
    %c16_i32_5 = arith.constant 16 : i32
    %10 = arith.cmpi sle, %9, %c16_i32_5 : i32
    %11 = arith.extui %10 : i1 to i32
    %c0_i32_6 = arith.constant 0 : i32
    %12 = arith.cmpi ne, %11, %c0_i32_6 : i32
    scf.if %12 {
      %19 = arith.mulf %8, %8 : vector<16x128xf32>
      %c0_10 = arith.constant 0 : index
      %c0_11 = arith.constant 0 : index
      %20 = vector.load %arg5[%c0_10, %c0_11] : memref<16x128xf32, #tpu.memory_space<vmem>>, vector<16x128xf32>
      %21 = arith.addf %20, %19 : vector<16x128xf32>
      %c0_12 = arith.constant 0 : index
      %c0_13 = arith.constant 0 : index
      %22 = vector.load %arg5[%c0_12, %c0_13] : memref<16x128xf32, #tpu.memory_space<vmem>>, vector<16x128xf32>
      tpu.vector_store %arg5[%c0_12, %c0_13], %21 {strides = array<i32>} : memref<16x128xf32, #tpu.memory_space<vmem>>, vector<16x128xf32>,
    } else {
    }
    %true = arith.constant true
    %13 = arith.xori %10, %true : i1
    %14 = arith.extui %13 : i1 to i32
    %c0_i32_7 = arith.constant 0 : i32
    %15 = arith.cmpi ne, %14, %c0_i32_7 : i32
    scf.if %15 {
      %19 = tpu.iota {dimensions = array<i32: 0>} : vector<16x128xi32>
      %20 = vector.broadcast %5 : i32 to vector<16x128xi32>
      %21 = arith.addi %19, %20 : vector<16x128xi32>
      %c16_i32_10 = arith.constant 16 : i32
      %22 = vector.broadcast %c16_i32_10 : i32 to vector<16x128xi32>
      %23 = arith.cmpi slt, %21, %22 : vector<16x128xi32>
      %cst = arith.constant 0.000000e+00 : f32
      %24 = vector.broadcast %cst : f32 to vector<16x128xf32>
      %25 = arith.select %23, %8, %24 : vector<16x128xi1>, vector<16x128xf32>
      %26 = arith.mulf %25, %25 : vector<16x128xf32>
      %c0_11 = arith.constant 0 : index
      %c0_12 = arith.constant 0 : index
      %27 = vector.load %arg5[%c0_11, %c0_12] : memref<16x128xf32, #tpu.memory_space<vmem>>, vector<16x128xf32>
      %28 = arith.addf %27, %26 : vector<16x128xf32>
      %c0_13 = arith.constant 0 : index
      %c0_14 = arith.constant 0 : index
      %29 = vector.load %arg5[%c0_13, %c0_14] : memref<16x128xf32, #tpu.memory_space<vmem>>, vector<16x128xf32>
      tpu.vector_store %arg5[%c0_13, %c0_14], %28 {strides = array<i32>} : memref<16x128xf32, #tpu.memory_space<vmem>>, vector<16x128xf32>,
    } else {
    }
    %c0_i32_8 = arith.constant 0 : i32
    %16 = arith.cmpi eq, %arg1, %c0_i32_8 : i32
    %17 = arith.extui %16 : i1 to i32
    %c0_i32_9 = arith.constant 0 : i32
    %18 = arith.cmpi ne, %17, %c0_i32_9 : i32
    scf.if %18 {
      %c0_10 = arith.constant 0 : index
      %c0_11 = arith.constant 0 : index
      %19 = vector.load %arg5[%c0_10, %c0_11] : memref<16x128xf32, #tpu.memory_space<vmem>>, vector<16x128xf32>
      %20 = vector.shape_cast %19 : vector<16x128xf32> to vector<1x16x128xf32>
      %cst = arith.constant dense<0.000000e+00> : vector<1xf32>
      %21 = vector.multi_reduction <add>, %20, %cst [1, 2] : vector<1x16x128xf32> to vector<1xf32>
      %22 = vector.shape_cast %21 : vector<1xf32> to vector<1x1x1xf32>
      %23 = vector.extract %22[0, 0, 0] : f32 from vector<1x1x1xf32>
      %c0_12 = arith.constant 0 : index
      %c0_13 = arith.constant 0 : index
      %24 = memref.load %arg4[%c0_12, %c0_13] : memref<1x1xf32, #tpu.memory_space<smem>>
      memref.store %23, %arg4[%c0_12, %c0_13] : memref<1x1xf32, #tpu.memory_space<smem>>
    } else {
    }
    return
  }
  func.func @transform_0(%arg0: i32, %arg1: i32) -> (i32, i32) {
    %c1_i32 = arith.constant 1 : i32
    %0 = arith.muli %arg0, %c1_i32 : i32
    %1 = arith.addi %0, %arg1 : i32
    %c0_i32 = arith.constant 0 : i32
    %2 = arith.minsi %1, %c0_i32 : i32
    %c0_i32_0 = arith.constant 0 : i32
    %c0_i32_1 = arith.constant 0 : i32
    return %2, %c0_i32_0 : i32, i32
  }
  func.func @transform_1(%arg0: i32, %arg1: i32) -> (i32, i32) {
    %c1_i32 = arith.constant 1 : i32
    %0 = arith.muli %arg0, %c1_i32 : i32
    %1 = arith.addi %0, %arg1 : i32
    %c0_i32 = arith.constant 0 : i32
    %2 = arith.minsi %1, %c0_i32 : i32
    %c0_i32_0 = arith.constant 0 : i32
    %c0_i32_1 = arith.constant 0 : i32
    return %2, %c0_i32_0 : i32, i32
  }
  func.func @transform_2(%arg0: i32, %arg1: i32) -> (i32, i32) {
    %c0_i32 = arith.constant 0 : i32
    %c0_i32_0 = arith.constant 0 : i32
    return %arg0, %c0_i32 : i32, i32
  }
}

</mosaic_0001>

<bundles_post_ra>
// kernel: tpu_custom_call.1
= control target key start
LH: loop header
LB: loop body
LE: loop exit
PB: predicated region body
PF: predicated region fallthrough
CT: control target
= control target key end

     0   :  { %7 = vsyncpa [#allocation4], 0  ;;  %s268_s0 = inlined_call_operand.hbm [shape: f32[16,128], index: 0, kind: input, shape index: {}]   ;;  %s269_s1 = inlined_call_operand.hbm [shape: f32[16,128], index: 1, kind: input, shape index: {}]   ;;  %s270_s2 = inlined_call_operand.hbm [shape: f32[1,1], index: 2, kind: output, shape index: {}]  }
   0x1   :  { %8 = vsyncpa [#allocation7], 0 }
   0x2   :  { %9 = vsyncpa [#allocation5], 0  ;;  %s212_s9 = smov [#allocation3]   ;;  %s152_s13 = scalar_lea.hbm %s268_s0, 256 }
   0x3   :  { %s21_s10 = sshll.u32 %s212_s9, 4  ;;  %p153_p0 = scmp.ne.s32.totalorder %s268_s0, %s152_s13  ;;  %s22_s10 = int_to_ptr.vmem [resolvable:$true] %s21_s10 }
   0x4   :  { %p156_p1 = scmp.lt.u32.totalorder %s152_s13, %s268_s0 }
   0x6   :  { %p158_p2 = pnand %p156_p1, %p153_p0 }
   0x8   :  { %161 = shalt.err (!%p158_p2)
}
   0x9   :  { %s162_s18 = scalar_lea.vmem %s22_s10, 256  ;;  %p167_p4 = scmp.lt.s32.totalorder %s22_s10, %s22_s10 }
   0xa   :  { %p163_p3 = scmp.ne.s32.totalorder %s22_s10, %s162_s18  ;;  %p168_p5 = scmp.lt.s32.totalorder %s162_s18, %s162_s18 }
   0xc   :  { %p169_p6 = por %p168_p5, %p167_p4 }
   0xe   :  { %p170_p7 = pnand %p169_p6, %p163_p3 }
  0x10   :  { %173 = shalt.err (!%p170_p7)
}
  0x11   :  { %s213_s19 = smov 128   ;;  %s214_s20 = smov 8  }
  0x12   :  { %27 = dma.hbm_to_vmem [thread:$0]  %s268_s0, 256, %s22_s10, [#allocation4], %s213_s19, %s213_s19, %s214_s20  }
  0x13   :  { %s215_s23 = smov [#allocation6]   ;;  %s174_s27 = scalar_lea.hbm %s269_s1, 256 }
  0x14   :  { %s39_s24 = sshll.u32 %s215_s23, 4  ;;  %p175_p8 = scmp.ne.s32.totalorder %s269_s1, %s174_s27  ;;  %s40_s24 = int_to_ptr.vmem [resolvable:$true] %s39_s24 }
  0x15   :  { %p178_p9 = scmp.lt.u32.totalorder %s174_s27, %s269_s1 }
  0x17   :  { %p180_p10 = pnand %p178_p9, %p175_p8 }
  0x19   :  { %183 = shalt.err (!%p180_p10)
}
  0x1a   :  { %s184_s4 = scalar_lea.vmem %s40_s24, 256  ;;  %p189_p12 = scmp.lt.s32.totalorder %s40_s24, %s40_s24 }
  0x1b   :  { %p185_p11 = scmp.ne.s32.totalorder %s40_s24, %s184_s4  ;;  %p190_p13 = scmp.lt.s32.totalorder %s184_s4, %s184_s4 }
  0x1d   :  { %p191_p0 = por %p190_p13, %p189_p12 }
  0x1f   :  { %p192_p1 = pnand %p191_p0, %p185_p11 }
  0x21   :  { %195 = shalt.err (!%p192_p1)
}
  0x22   :  { %45 = dma.hbm_to_vmem [thread:$0]  %s269_s1, 256, %s40_s24, [#allocation7], %s213_s19, %s213_s19, %s214_s20  }
  0x23   :  { %206 = dma.done.wait [#allocation4], 256  }
  0x24   :  { %207 = vsyncadd [#allocation4], 4294967040 }
  0x25   :  { %208 = dma.done.wait [#allocation7], 256  }
  0x26   :  { %209 = vsyncadd [#allocation7], 4294967040  ;;  %v68_v0 = vld [vmem:[#allocation3] sm:$0xff]  ;;  %v69_v1 = vld [vmem:[#allocation3 + $0x8] sm:$0xff]  ;;  %s196_s8 = scalar_lea.hbm %s270_s2, 16 }
  0x27   :  { %v70_v2 = vld [vmem:[#allocation6] sm:$0xff]  ;;  %v71_v3 = vld [vmem:[#allocation6 + $0x8] sm:$0xff]  ;;  %p197_p2 = scmp.ne.s32.totalorder %s270_s2, %s196_s8  ;;  %p200_p3 = scmp.lt.u32.totalorder %s196_s8, %s270_s2 }
  0x28   :  { %v72_v4 = vsub.f32 %v68_v0, %v70_v2  ;;  %v73_v5 = vsub.f32 %v69_v1, %v71_v3 }
  0x29   :  { %p202_p4 = pnand %p200_p3, %p197_p2 }
  0x2a   :  { %v79_v6 = vmul.f32 %v72_v4, %v72_v4  ;;  %v80_v7 = vmul.f32 %v73_v5, %v73_v5 }
  0x2c   :  { %v114_v8 = vadd.f32 %v80_v7, %v79_v6 }
  0x2e   :  { %115 = vadd.xlane.f32.xlu0 %v114_v8 }
  0xbb   :  { %v116_v9 = vpop.xlane.xlu0 %115 }
  0xbc   :  { %v117_v10 = vrot.slane %v116_v9, 4 }
  0xbe   :  { %v118_v11 = vadd.f32 %v117_v10, %v116_v9 }
  0xc0   :  { %v119_v12 = vrot.slane %v118_v11, 2 }
  0xc2   :  { %v120_v13 = vadd.f32 %v119_v12, %v118_v11 }
  0xc4   :  { %v121_v14 = vrot.slane %v120_v13, 1 }
  0xc6   :  { %v122_v15 = vadd.f32 %v121_v14, %v120_v13 }
  0xc8   :  { %145 = vpush %v122_v15 }
  0xf9   :  { %s146_s1 = spop %145 }
  0xfa   :  { %125 = sst [smem:[#allocation8]] %s146_s1 }
  0xfb   :  { %205 = shalt.err (!%p202_p4)
}
  0xfc   :  { %s216_s13 = smov [#allocation8]  }
  0xfd   :  { %133 = dma.smem_to_hbm %s216_s13, 16, %s270_s2, [#allocation5]  }
  0xfe   :  { %210 = dma.done.wait [#allocation5], 16  }
  0xff   :  { %211 = vsyncadd [#allocation5], 4294967280 }
 0x100   :  { %137 = sfence }
 0x101   :  { %138 = vsyncpa [#allocation4], 1 }
 0x102   :  { %139 = vsyncpa [#allocation7], 1 }
 0x103   :  { %140 = vsyncpa [#allocation5], 1 }

</bundles_post_ra>
